<compile_context>
chip_gen: v7x
topology: tpu7x:2x2x1
jax: 0.10.0
libtpu: 0.0.40
codegen_flags: <defaults>
</compile_context>

<pallas_src>
import jax
import jax.numpy as jnp
from jax.experimental import pallas as pl
from jax.experimental.pallas import tpu as pltpu

_LANE = 128   # lanes per vreg (batch minor axis inside the kernel)
_SUB = 8      # sublanes per (32-bit) vreg


def _round_up(n, m):
    return ((n + m - 1) // m) * m


def linear_kernel(w_ref, b_ref, x_ref, o_ref):
    """One batch tile of y^T = W @ x^T + b.

    w_ref: (out_f, in_f)   f32 in SMEM (scalar reads)
    b_ref: (out_f,)        f32 in SMEM (scalar reads)
    x_ref: (in_f, S, 128)  VMEM -- batch packed densely on sublanes x lanes
    o_ref: (out_f, S, 128) VMEM
    """
    out_f, in_f = w_ref.shape
    # out_f * in_f = 15 scalar*slab FMAs on full (S,128) slabs (VPU only).
    for j in range(out_f):
        acc = x_ref[0].astype(jnp.float32) * w_ref[j, 0]
        for k in range(1, in_f):
            acc = acc + x_ref[k].astype(jnp.float32) * w_ref[j, k]
        o_ref[j] = (acc + b_ref[j]).astype(o_ref.dtype)


def logistic_regression_forward(x, w, b, *, vmem_budget_bytes=12 << 20):
    """x: (B, in_f), w: (out_f, in_f), b: (out_f,) -> (B, out_f) in x.dtype."""
    B, in_f = x.shape
    out_f = w.shape[0]
    x_bytes = jnp.dtype(x.dtype).itemsize
    o_dtype = x.dtype
    o_bytes = jnp.dtype(o_dtype).itemsize

    # Sublane granularity accounting for packed dtypes (8 for f32, 16 for bf16).
    sub = _SUB * max(1, 4 // x_bytes)

    # ---- Tile plan: rows of 128 batch elements; S rows per grid step. ----------
    n_rows = pl.cdiv(B, _LANE)
    # Double-buffered input + output bytes per row of 128 batch elements.
    row_bytes = 2 * _LANE * (in_f * x_bytes + out_f * o_bytes)
    max_rows = max(sub, (vmem_budget_bytes // row_bytes) // sub * sub)

    if n_rows > max_rows:
        num_tiles = pl.cdiv(n_rows, max_rows)
    elif n_rows >= 2 * sub:
        num_tiles = 2            # give both v7x TensorCores a tile
    else:
        num_tiles = 1

    if num_tiles > 1:
        rows_per_tile = _round_up(pl.cdiv(n_rows, num_tiles), sub)
    else:
        rows_per_tile = n_rows   # (S,128) equals the full dims -> no (8,128) issue
    padded_rows = rows_per_tile * num_tiles
    padded_b = padded_rows * _LANE

    # ---- Layout plumbing (XLA side): (B, in_f) -> (in_f, padded_rows, 128). ----
    # The transpose is one extra pass over x; the reshape of the transposed,
    # row-major array is free.
    x_t = jnp.transpose(x)                                   # (in_f, B)
    if padded_b != B:
        x_t = jnp.pad(x_t, ((0, 0), (0, padded_b - B)))
    x_t = x_t.reshape(in_f, padded_rows, _LANE)

    block_bytes = 2 * rows_per_tile * _LANE * (in_f * x_bytes + out_f * o_bytes)
    vmem_limit = int(min(max(block_bytes + (12 << 20), 16 << 20), 32 << 20))

    cost = pl.CostEstimate(
        flops=2 * padded_b * in_f * out_f,
        transcendentals=0,
        bytes_accessed=padded_b * (in_f * x_bytes + out_f * o_bytes)
        + (w.size + b.size) * 4,
    )

    y_t = pl.pallas_call(
        linear_kernel,
        out_shape=jax.ShapeDtypeStruct((out_f, padded_rows, _LANE), o_dtype),
        grid_spec=pltpu.PrefetchScalarGridSpec(
            num_scalar_prefetch=0,
            grid=(num_tiles,),
            in_specs=[
                # W and b resident in SMEM across all grid steps (scalar reads).
                pl.BlockSpec(memory_space=pltpu.MemorySpace.SMEM),
                pl.BlockSpec(memory_space=pltpu.MemorySpace.SMEM),
                # Lane+sublane-dense batch tiles (default double buffering).
                pl.BlockSpec((in_f, rows_per_tile, _LANE), lambda i: (0, i, 0)),
            ],
            out_specs=pl.BlockSpec((out_f, rows_per_tile, _LANE),
                                   lambda i: (0, i, 0)),
        ),
        compiler_params=pltpu.CompilerParams(
            dimension_semantics=("parallel",),    # batch tiles are independent
            vmem_limit_bytes=vmem_limit,
        ),
        cost_estimate=cost,
    )(w.astype(jnp.float32), b.astype(jnp.float32), x_t)

    # (out_f, padded_rows, 128) -> (B, out_f); drop batch padding.
    return jnp.transpose(y_t.reshape(out_f, padded_b)[:, :B])


if __name__ == "__main__":
    key = jax.random.PRNGKey(0)
    k_w, k_b, k_x1, k_x2, k_x3 = jax.random.split(key, 5)

    IN_F, OUT_F = 5, 3

    # Deterministic parameter init (mimic nn.Linear's uniform(-1/sqrt(in), 1/sqrt(in)))
    bound = 1.0 / (IN_F ** 0.5)
    w = jax.random.uniform(k_w, (OUT_F, IN_F), jnp.float32, -bound, bound)
    b = jax.random.uniform(k_b, (OUT_F,), jnp.float32, -bound, bound)

    # Small batch (toy usage; single 1-row tile).
    x1 = jax.random.normal(k_x1, (8, IN_F), jnp.float32)
    y1 = logistic_regression_forward(x1, w, b)
    jax.block_until_ready(y1)
    assert y1.shape == (8, OUT_F)
    assert jnp.allclose(y1, x1 @ w.T + b, atol=1e-5, rtol=1e-5)

    # Larger batch: exercises the multi-tile "parallel" path (grid = 2).
    x2 = jax.random.normal(k_x2, (5000, IN_F), jnp.float32)
    y2 = logistic_regression_forward(x2, w, b)
    jax.block_until_ready(y2)
    assert y2.shape == (5000, OUT_F)
    assert jnp.allclose(y2, x2 @ w.T + b, atol=1e-5, rtol=1e-5)

    # bf16 I/O path (f32 accumulation inside the kernel, bf16 load/store).
    x3 = jax.random.normal(k_x3, (512, IN_F), jnp.float32).astype(jnp.bfloat16)
    y3 = logistic_regression_forward(x3, w, b)
    jax.block_until_ready(y3)
    assert y3.shape == (512, OUT_F) and y3.dtype == jnp.bfloat16
    ref3 = x3.astype(jnp.float32) @ w.T + b
    assert jnp.allclose(y3.astype(jnp.float32), ref3, atol=5e-2, rtol=5e-2)

    print("KERNEL_OK")
</pallas_src>

<mosaic_0001>
module attributes {stable_mosaic.version = 11 : i64} {
  func.func @linear_kernel(%arg0: i32, %arg1: memref<3x5xf32, #tpu.memory_space<smem>>, %arg2: memref<3xf32, #tpu.memory_space<smem>>, %arg3: memref<5x1x128xf32, #tpu.memory_space<vmem>>, %arg4: memref<3x1x128xf32, #tpu.memory_space<vmem>>) attributes {dimension_semantics = [#tpu.dimension_semantics<parallel>], iteration_bounds = array<i64: 1>, scalar_prefetch = 0 : i64, scratch_operands = 0 : i64, tpu.core_type = #tpu.core_type<tc>, window_params = [{transform_indices = @transform_0, window_bounds = array<i64: 3, 5>}, {transform_indices = @transform_1, window_bounds = array<i64: 3>}, {transform_indices = @transform_2, window_bounds = array<i64: 5, 1, 128>}, {transform_indices = @transform_3, window_bounds = array<i64: 3, 1, 128>}]} {
    %c0 = arith.constant 0 : index
    %c0_0 = arith.constant 0 : index
    %c0_1 = arith.constant 0 : index
    %0 = vector.load %arg3[%c0, %c0_0, %c0_1] : memref<5x1x128xf32, #tpu.memory_space<vmem>>, vector<1x1x128xf32>
    %1 = vector.shape_cast %0 : vector<1x1x128xf32> to vector<1x128xf32>
    %c0_2 = arith.constant 0 : index
    %c0_3 = arith.constant 0 : index
    %2 = memref.load %arg1[%c0_2, %c0_3] : memref<3x5xf32, #tpu.memory_space<smem>>
    %3 = vector.broadcast %2 : f32 to vector<1x128xf32>
    %4 = arith.mulf %1, %3 : vector<1x128xf32>
    %c1 = arith.constant 1 : index
    %c0_4 = arith.constant 0 : index
    %c0_5 = arith.constant 0 : index
    %5 = vector.load %arg3[%c1, %c0_4, %c0_5] : memref<5x1x128xf32, #tpu.memory_space<vmem>>, vector<1x1x128xf32>
    %6 = vector.shape_cast %5 : vector<1x1x128xf32> to vector<1x128xf32>
    %c0_6 = arith.constant 0 : index
    %c1_7 = arith.constant 1 : index
    %7 = memref.load %arg1[%c0_6, %c1_7] : memref<3x5xf32, #tpu.memory_space<smem>>
    %8 = vector.broadcast %7 : f32 to vector<1x128xf32>
    %9 = arith.mulf %6, %8 : vector<1x128xf32>
    %10 = arith.addf %4, %9 : vector<1x128xf32>
    %c2 = arith.constant 2 : index
    %c0_8 = arith.constant 0 : index
    %c0_9 = arith.constant 0 : index
    %11 = vector.load %arg3[%c2, %c0_8, %c0_9] : memref<5x1x128xf32, #tpu.memory_space<vmem>>, vector<1x1x128xf32>
    %12 = vector.shape_cast %11 : vector<1x1x128xf32> to vector<1x128xf32>
    %c0_10 = arith.constant 0 : index
    %c2_11 = arith.constant 2 : index
    %13 = memref.load %arg1[%c0_10, %c2_11] : memref<3x5xf32, #tpu.memory_space<smem>>
    %14 = vector.broadcast %13 : f32 to vector<1x128xf32>
    %15 = arith.mulf %12, %14 : vector<1x128xf32>
    %16 = arith.addf %10, %15 : vector<1x128xf32>
    %c3 = arith.constant 3 : index
    %c0_12 = arith.constant 0 : index
    %c0_13 = arith.constant 0 : index
    %17 = vector.load %arg3[%c3, %c0_12, %c0_13] : memref<5x1x128xf32, #tpu.memory_space<vmem>>, vector<1x1x128xf32>
    %18 = vector.shape_cast %17 : vector<1x1x128xf32> to vector<1x128xf32>
    %c0_14 = arith.constant 0 : index
    %c3_15 = arith.constant 3 : index
    %19 = memref.load %arg1[%c0_14, %c3_15] : memref<3x5xf32, #tpu.memory_space<smem>>
    %20 = vector.broadcast %19 : f32 to vector<1x128xf32>
    %21 = arith.mulf %18, %20 : vector<1x128xf32>
    %22 = arith.addf %16, %21 : vector<1x128xf32>
    %c4 = arith.constant 4 : index
    %c0_16 = arith.constant 0 : index
    %c0_17 = arith.constant 0 : index
    %23 = vector.load %arg3[%c4, %c0_16, %c0_17] : memref<5x1x128xf32, #tpu.memory_space<vmem>>, vector<1x1x128xf32>
    %24 = vector.shape_cast %23 : vector<1x1x128xf32> to vector<1x128xf32>
    %c0_18 = arith.constant 0 : index
    %c4_19 = arith.constant 4 : index
    %25 = memref.load %arg1[%c0_18, %c4_19] : memref<3x5xf32, #tpu.memory_space<smem>>
    %26 = vector.broadcast %25 : f32 to vector<1x128xf32>
    %27 = arith.mulf %24, %26 : vector<1x128xf32>
    %28 = arith.addf %22, %27 : vector<1x128xf32>
    %c0_20 = arith.constant 0 : index
    %29 = memref.load %arg2[%c0_20] : memref<3xf32, #tpu.memory_space<smem>>
    %30 = vector.broadcast %29 : f32 to vector<1x128xf32>
    %31 = arith.addf %28, %30 : vector<1x128xf32>
    %c0_21 = arith.constant 0 : index
    %c0_22 = arith.constant 0 : index
    %c0_23 = arith.constant 0 : index
    %32 = vector.load %arg4[%c0_21, %c0_22, %c0_23] : memref<3x1x128xf32, #tpu.memory_space<vmem>>, vector<1x1x128xf32>
    %33 = vector.shape_cast %32 : vector<1x1x128xf32> to vector<1x128xf32>
    %34 = vector.shape_cast %31 : vector<1x128xf32> to vector<1x1x128xf32>
    tpu.vector_store %arg4[%c0_21, %c0_22, %c0_23], %34 {strides = array<i32>} : memref<3x1x128xf32, #tpu.memory_space<vmem>>, vector<1x1x128xf32>,
    %c0_24 = arith.constant 0 : index
    %c0_25 = arith.constant 0 : index
    %c0_26 = arith.constant 0 : index
    %35 = vector.load %arg3[%c0_24, %c0_25, %c0_26] : memref<5x1x128xf32, #tpu.memory_space<vmem>>, vector<1x1x128xf32>
    %36 = vector.shape_cast %35 : vector<1x1x128xf32> to vector<1x128xf32>
    %c1_27 = arith.constant 1 : index
    %c0_28 = arith.constant 0 : index
    %37 = memref.load %arg1[%c1_27, %c0_28] : memref<3x5xf32, #tpu.memory_space<smem>>
    %38 = vector.broadcast %37 : f32 to vector<1x128xf32>
    %39 = arith.mulf %36, %38 : vector<1x128xf32>
    %c1_29 = arith.constant 1 : index
    %c0_30 = arith.constant 0 : index
    %c0_31 = arith.constant 0 : index
    %40 = vector.load %arg3[%c1_29, %c0_30, %c0_31] : memref<5x1x128xf32, #tpu.memory_space<vmem>>, vector<1x1x128xf32>
    %41 = vector.shape_cast %40 : vector<1x1x128xf32> to vector<1x128xf32>
    %c1_32 = arith.constant 1 : index
    %c1_33 = arith.constant 1 : index
    %42 = memref.load %arg1[%c1_32, %c1_33] : memref<3x5xf32, #tpu.memory_space<smem>>
    %43 = vector.broadcast %42 : f32 to vector<1x128xf32>
    %44 = arith.mulf %41, %43 : vector<1x128xf32>
    %45 = arith.addf %39, %44 : vector<1x128xf32>
    %c2_34 = arith.constant 2 : index
    %c0_35 = arith.constant 0 : index
    %c0_36 = arith.constant 0 : index
    %46 = vector.load %arg3[%c2_34, %c0_35, %c0_36] : memref<5x1x128xf32, #tpu.memory_space<vmem>>, vector<1x1x128xf32>
    %47 = vector.shape_cast %46 : vector<1x1x128xf32> to vector<1x128xf32>
    %c1_37 = arith.constant 1 : index
    %c2_38 = arith.constant 2 : index
    %48 = memref.load %arg1[%c1_37, %c2_38] : memref<3x5xf32, #tpu.memory_space<smem>>
    %49 = vector.broadcast %48 : f32 to vector<1x128xf32>
    %50 = arith.mulf %47, %49 : vector<1x128xf32>
    %51 = arith.addf %45, %50 : vector<1x128xf32>
    %c3_39 = arith.constant 3 : index
    %c0_40 = arith.constant 0 : index
    %c0_41 = arith.constant 0 : index
    %52 = vector.load %arg3[%c3_39, %c0_40, %c0_41] : memref<5x1x128xf32, #tpu.memory_space<vmem>>, vector<1x1x128xf32>
    %53 = vector.shape_cast %52 : vector<1x1x128xf32> to vector<1x128xf32>
    %c1_42 = arith.constant 1 : index
    %c3_43 = arith.constant 3 : index
    %54 = memref.load %arg1[%c1_42, %c3_43] : memref<3x5xf32, #tpu.memory_space<smem>>
    %55 = vector.broadcast %54 : f32 to vector<1x128xf32>
    %56 = arith.mulf %53, %55 : vector<1x128xf32>
    %57 = arith.addf %51, %56 : vector<1x128xf32>
    %c4_44 = arith.constant 4 : index
    %c0_45 = arith.constant 0 : index
    %c0_46 = arith.constant 0 : index
    %58 = vector.load %arg3[%c4_44, %c0_45, %c0_46] : memref<5x1x128xf32, #tpu.memory_space<vmem>>, vector<1x1x128xf32>
    %59 = vector.shape_cast %58 : vector<1x1x128xf32> to vector<1x128xf32>
    %c1_47 = arith.constant 1 : index
    %c4_48 = arith.constant 4 : index
    %60 = memref.load %arg1[%c1_47, %c4_48] : memref<3x5xf32, #tpu.memory_space<smem>>
    %61 = vector.broadcast %60 : f32 to vector<1x128xf32>
    %62 = arith.mulf %59, %61 : vector<1x128xf32>
    %63 = arith.addf %57, %62 : vector<1x128xf32>
    %c1_49 = arith.constant 1 : index
    %64 = memref.load %arg2[%c1_49] : memref<3xf32, #tpu.memory_space<smem>>
    %65 = vector.broadcast %64 : f32 to vector<1x128xf32>
    %66 = arith.addf %63, %65 : vector<1x128xf32>
    %c1_50 = arith.constant 1 : index
    %c0_51 = arith.constant 0 : index
    %c0_52 = arith.constant 0 : index
    %67 = vector.load %arg4[%c1_50, %c0_51, %c0_52] : memref<3x1x128xf32, #tpu.memory_space<vmem>>, vector<1x1x128xf32>
    %68 = vector.shape_cast %67 : vector<1x1x128xf32> to vector<1x128xf32>
    %69 = vector.shape_cast %66 : vector<1x128xf32> to vector<1x1x128xf32>
    tpu.vector_store %arg4[%c1_50, %c0_51, %c0_52], %69 {strides = array<i32>} : memref<3x1x128xf32, #tpu.memory_space<vmem>>, vector<1x1x128xf32>,
    %c0_53 = arith.constant 0 : index
    %c0_54 = arith.constant 0 : index
    %c0_55 = arith.constant 0 : index
    %70 = vector.load %arg3[%c0_53, %c0_54, %c0_55] : memref<5x1x128xf32, #tpu.memory_space<vmem>>, vector<1x1x128xf32>
    %71 = vector.shape_cast %70 : vector<1x1x128xf32> to vector<1x128xf32>
    %c2_56 = arith.constant 2 : index
    %c0_57 = arith.constant 0 : index
    %72 = memref.load %arg1[%c2_56, %c0_57] : memref<3x5xf32, #tpu.memory_space<smem>>
    %73 = vector.broadcast %72 : f32 to vector<1x128xf32>
    %74 = arith.mulf %71, %73 : vector<1x128xf32>
    %c1_58 = arith.constant 1 : index
    %c0_59 = arith.constant 0 : index
    %c0_60 = arith.constant 0 : index
    %75 = vector.load %arg3[%c1_58, %c0_59, %c0_60] : memref<5x1x128xf32, #tpu.memory_space<vmem>>, vector<1x1x128xf32>
    %76 = vector.shape_cast %75 : vector<1x1x128xf32> to vector<1x128xf32>
    %c2_61 = arith.constant 2 : index
    %c1_62 = arith.constant 1 : index
    %77 = memref.load %arg1[%c2_61, %c1_62] : memref<3x5xf32, #tpu.memory_space<smem>>
    %78 = vector.broadcast %77 : f32 to vector<1x128xf32>
    %79 = arith.mulf %76, %78 : vector<1x128xf32>
    %80 = arith.addf %74, %79 : vector<1x128xf32>
    %c2_63 = arith.constant 2 : index
    %c0_64 = arith.constant 0 : index
    %c0_65 = arith.constant 0 : index
    %81 = vector.load %arg3[%c2_63, %c0_64, %c0_65] : memref<5x1x128xf32, #tpu.memory_space<vmem>>, vector<1x1x128xf32>
    %82 = vector.shape_cast %81 : vector<1x1x128xf32> to vector<1x128xf32>
    %c2_66 = arith.constant 2 : index
    %c2_67 = arith.constant 2 : index
    %83 = memref.load %arg1[%c2_66, %c2_67] : memref<3x5xf32, #tpu.memory_space<smem>>
    %84 = vector.broadcast %83 : f32 to vector<1x128xf32>
    %85 = arith.mulf %82, %84 : vector<1x128xf32>
    %86 = arith.addf %80, %85 : vector<1x128xf32>
    %c3_68 = arith.constant 3 : index
    %c0_69 = arith.constant 0 : index
    %c0_70 = arith.constant 0 : index
    %87 = vector.load %arg3[%c3_68, %c0_69, %c0_70] : memref<5x1x128xf32, #tpu.memory_space<vmem>>, vector<1x1x128xf32>
    %88 = vector.shape_cast %87 : vector<1x1x128xf32> to vector<1x128xf32>
    %c2_71 = arith.constant 2 : index
    %c3_72 = arith.constant 3 : index
    %89 = memref.load %arg1[%c2_71, %c3_72] : memref<3x5xf32, #tpu.memory_space<smem>>
    %90 = vector.broadcast %89 : f32 to vector<1x128xf32>
    %91 = arith.mulf %88, %90 : vector<1x128xf32>
    %92 = arith.addf %86, %91 : vector<1x128xf32>
    %c4_73 = arith.constant 4 : index
    %c0_74 = arith.constant 0 : index
    %c0_75 = arith.constant 0 : index
    %93 = vector.load %arg3[%c4_73, %c0_74, %c0_75] : memref<5x1x128xf32, #tpu.memory_space<vmem>>, vector<1x1x128xf32>
    %94 = vector.shape_cast %93 : vector<1x1x128xf32> to vector<1x128xf32>
    %c2_76 = arith.constant 2 : index
    %c4_77 = arith.constant 4 : index
    %95 = memref.load %arg1[%c2_76, %c4_77] : memref<3x5xf32, #tpu.memory_space<smem>>
    %96 = vector.broadcast %95 : f32 to vector<1x128xf32>
    %97 = arith.mulf %94, %96 : vector<1x128xf32>
    %98 = arith.addf %92, %97 : vector<1x128xf32>
    %c2_78 = arith.constant 2 : index
    %99 = memref.load %arg2[%c2_78] : memref<3xf32, #tpu.memory_space<smem>>
    %100 = vector.broadcast %99 : f32 to vector<1x128xf32>
    %101 = arith.addf %98, %100 : vector<1x128xf32>
    %c2_79 = arith.constant 2 : index
    %c0_80 = arith.constant 0 : index
    %c0_81 = arith.constant 0 : index
    %102 = vector.load %arg4[%c2_79, %c0_80, %c0_81] : memref<3x1x128xf32, #tpu.memory_space<vmem>>, vector<1x1x128xf32>
    %103 = vector.shape_cast %102 : vector<1x1x128xf32> to vector<1x128xf32>
    %104 = vector.shape_cast %101 : vector<1x128xf32> to vector<1x1x128xf32>
    tpu.vector_store %arg4[%c2_79, %c0_80, %c0_81], %104 {strides = array<i32>} : memref<3x1x128xf32, #tpu.memory_space<vmem>>, vector<1x1x128xf32>,
    return
  }
  func.func @transform_0(%arg0: i32) -> (i32, i32) {
    %c0_i32 = arith.constant 0 : i32
    %c0_i32_0 = arith.constant 0 : i32
    %c0_i32_1 = arith.constant 0 : i32
    return %c0_i32, %c0_i32_0 : i32, i32
  }
  func.func @transform_1(%arg0: i32) -> i32 {
    %c0_i32 = arith.constant 0 : i32
    %c0_i32_0 = arith.constant 0 : i32
    return %c0_i32 : i32
  }
  func.func @transform_2(%arg0: i32) -> (i32, i32, i32) {
    %c0_i32 = arith.constant 0 : i32
    %c0_i32_0 = arith.constant 0 : i32
    %c0_i32_1 = arith.constant 0 : i32
    return %c0_i32, %arg0, %c0_i32_0 : i32, i32, i32
  }
  func.func @transform_3(%arg0: i32) -> (i32, i32, i32) {
    %c0_i32 = arith.constant 0 : i32
    %c0_i32_0 = arith.constant 0 : i32
    %c0_i32_1 = arith.constant 0 : i32
    return %c0_i32, %arg0, %c0_i32_0 : i32, i32, i32
  }
}

</mosaic_0001>

<bundles_post_ra>
// kernel: tpu_custom_call.1
= control target key start
LH: loop header
LB: loop body
LE: loop exit
PB: predicated region body
PF: predicated region fallthrough
CT: control target
= control target key end

     0   :  { %8 = vsyncpa [#allocation4], 0  ;;  %s365_s0 = inlined_call_operand.hbm [shape: f32[3,5], index: 0, kind: input, shape index: {}]   ;;  %s366_s1 = inlined_call_operand.vmem [shape: f32[3], index: 1, kind: input, shape index: {}]   ;;  %s367_s2 = inlined_call_operand.vmem [shape: f32[5,1,128], index: 2, kind: input, shape index: {}]   ;;  %s368_s3 = inlined_call_operand.hbm [shape: f32[3,1,128], index: 3, kind: output, shape index: {}]  }
   0x1   :  { %9 = vsyncpa [#allocation5], 0 }
   0x2   :  { %10 = vsyncpa [#allocation3], 0  ;;  %s25_s14 = sshll.u32 %s366_s1, 4  ;;  %s179_s17 = scalar_lea.hbm %s365_s0, 64  ;;  %s26_s14 = int_to_ptr.vmem [resolvable:$true] %s25_s14 }
   0x3   :  { %p180_p0 = scmp.ne.s32.totalorder %s365_s0, %s179_s17  ;;  %p183_p1 = scmp.lt.u32.totalorder %s179_s17, %s365_s0 }
   0x5   :  { %p185_p2 = pnand %p183_p1, %p180_p0 }
   0x7   :  { %188 = shalt.err (!%p185_p2)
}
   0x8   :  { %s229_s22 = smov [#allocation2]   ;;  %s189_s1 = scalar_lea.vmem %s26_s14, 16 }
   0x9   :  { %18 = dma.hbm_to_smem %s365_s0, 64, %s229_s22, [#allocation4]  }
   0xa   :  { %p190_p3 = scmp.ne.s32.totalorder %s26_s14, %s189_s1  ;;  %p194_p4 = scmp.lt.s32.totalorder %s26_s14, %s26_s14 }
   0xb   :  { %p195_p5 = scmp.lt.s32.totalorder %s189_s1, %s189_s1 }
   0xd   :  { %p196_p6 = por %p195_p5, %p194_p4 }
   0xf   :  { %p197_p7 = pnand %p196_p6, %p190_p3 }
  0x11   :  { %200 = shalt.err (!%p197_p7)
}
  0x12   :  { %s230_s25 = smov [#allocation6]  }
  0x13   :  { %28 = dma.vmem_to_smem %s26_s14, 16, %s230_s25, [#allocation5]  }
  0x14   :  { %223 = dma.done.wait [#allocation4], 64  }
  0x15   :  { %224 = vsyncadd [#allocation4], 4294967232 }
  0x16   :  { %225 = dma.done.wait [#allocation5], 16  }
  0x17   :  { %226 = vsyncadd [#allocation5], 4294967280 }
  0x18   :  { %37 = sfence }
  0x19   :  { %s39_s26 = sld [smem:[#allocation2]]  ;;  %s147_s27 = sld [smem:[#allocation2 + $0x1]]  ;;  %v38_v0 = vld [vmem:[%s367_s2] sm:$0x1]  ;;  %v146_v1 = vld [vmem:[%s367_s2 + $0x1] sm:$0x1] }
  0x1a   :  { %s149_s28 = sld [smem:[#allocation2 + $0x2]]  ;;  %s151_s29 = sld [smem:[#allocation2 + $0x3]]  ;;  %v148_v2 = vld [vmem:[%s367_s2 + $0x2] sm:$0x1]  ;;  %v150_v7 = vld [vmem:[%s367_s2 + $0x3] sm:$0x1] }
  0x1b   :  { %s272_s4 = sld [smem:[#allocation2 + $0x4]]  ;;  %s277_s7 = sld [smem:[#allocation2 + $0x80]]  ;;  %v152_v8 = vld [vmem:[%s367_s2 + $0x4] sm:$0x1]  ;;  %v70_v12 = vld [vmem:[%s367_s2] sm:$0x1] }
  0x1c   :  { %s279_s8 = sld [smem:[#allocation2 + $0x81]]  ;;  %s284_s11 = sld [smem:[#allocation6]]  ;;  %v155_v13 = vld [vmem:[%s367_s2 + $0x1] sm:$0x1]  ;;  %v157_v15 = vld [vmem:[%s367_s2 + $0x2] sm:$0x1] }
  0x1d   :  { %s286_s12 = sld [smem:[#allocation2 + $0x82]]  ;;  %s288_s13 = sld [smem:[#allocation2 + $0x83]]  ;;  %v159_v20 = vld [vmem:[%s367_s2 + $0x3] sm:$0x1]  ;;  %v161_v25 = vld [vmem:[%s367_s2 + $0x4] sm:$0x1] }
  0x1e   :  { %s290_s14 = sld [smem:[#allocation2 + $0x84]]  ;;  %s298_s19 = sld [smem:[#allocation2 + $0x100]]  ;;  %v99_v30 = vld [vmem:[%s367_s2] sm:$0x1]  ;;  %v165_v31 = vld [vmem:[%s367_s2 + $0x1] sm:$0x1] }
  0x1f   :  { %v40_v3 = vstv %s39_s26  ;;  %v45_v5 = vstv %s147_s27  ;;  %s306_s24 = sld [smem:[#allocation2 + $0x101]]  ;;  %s312_s26 = sld [smem:[#allocation2 + $0x102]]  ;;  %v167_v35 = vld [vmem:[%s367_s2 + $0x2] sm:$0x1]  ;;  %v169_v40 = vld [vmem:[%s367_s2 + $0x3] sm:$0x1] }
  0x20   :  { %v41_v4 = vmul.f32 %v40_v3, %v38_v0  ;;  %v51_v6 = vstv %s149_s28  ;;  %v46_v9 = vmul.f32 %v146_v1, %v45_v5  ;;  %v57_v11 = vstv %s151_s29  ;;  %s314_s27 = sld [smem:[#allocation2 + $0x103]]  ;;  %s321_s0 = sld [smem:[#allocation6 + $0x1]]  ;;  %v171_v48 = vld [vmem:[%s367_s2 + $0x4] sm:$0x1] }
  0x21   :  { %v52_v10 = vmul.f32 %v148_v2, %v51_v6  ;;  %v63_v14 = vstv %s272_s4  ;;  %v58_v17 = vmul.f32 %v150_v7, %v57_v11  ;;  %v72_v18 = vstv %s277_s7  ;;  %s323_s30 = sld [smem:[#allocation2 + $0x104]]  ;;  %s173_s15 = sld [smem:[#allocation6 + $0x2]] }
  0x22   :  { %v47_v16 = vadd.f32 %v46_v9, %v41_v4  ;;  %v76_v19 = vstv %s279_s8  ;;  %v64_v21 = vmul.f32 %v152_v8, %v63_v14  ;;  %v73_v22 = vmul.f32 %v72_v18, %v70_v12  ;;  %s231_s17 = smov [#allocation7]  }
  0x23   :  { %v77_v23 = vmul.f32 %v155_v13, %v76_v19  ;;  %v81_v24 = vstv %s286_s12  ;;  %v86_v28 = vstv %s288_s13  ;;  %v67_v32 = vstv %s284_s11  ;;  %s133_s18 = sshll.u32 %s231_s17, 4  ;;  %s134_s18 = int_to_ptr.vmem [resolvable:$true] %s133_s18 }
  0x24   :  { %v53_v26 = vadd.f32 %v52_v10, %v47_v16  ;;  %v82_v27 = vmul.f32 %v157_v15, %v81_v24  ;;  %v91_v29 = vstv %s290_s14  ;;  %v87_v34 = vmul.f32 %v159_v20, %v86_v28  ;;  %s201_s2 = scalar_lea.vmem %s134_s18, 48  ;;  %p206_p9 = scmp.lt.s32.totalorder %s134_s18, %s134_s18 }
  0x25   :  { %v78_v33 = vadd.f32 %v77_v23, %v73_v22  ;;  %v92_v37 = vmul.f32 %v161_v25, %v91_v29  ;;  %v101_v38 = vstv %s298_s19  ;;  %v105_v39 = vstv %s306_s24  ;;  %p202_p8 = scmp.ne.s32.totalorder %s134_s18, %s201_s2  ;;  %s205_s19 = scalar_lea.vmem %s134_s18, 64 }
  0x26   :  { %v59_v36 = vadd.f32 %v58_v17, %v53_v26  ;;  %v102_v42 = vmul.f32 %v101_v38, %v99_v30  ;;  %v106_v43 = vmul.f32 %v165_v31, %v105_v39  ;;  %v110_v44 = vstv %s312_s26  ;;  %p207_p10 = scmp.lt.s32.totalorder %s205_s19, %s201_s2 }
  0x27   :  { %v83_v41 = vadd.f32 %v82_v27, %v78_v33  ;;  %v111_v46 = vmul.f32 %v167_v35, %v110_v44  ;;  %v115_v47 = vstv %s314_s27  ;;  %v120_v49 = vstv %s323_s30 }
  0x28   :  { %v65_v45 = vadd.f32 %v64_v21, %v59_v36  ;;  %v107_v51 = vadd.f32 %v106_v43, %v102_v42  ;;  %v116_v52 = vmul.f32 %v169_v40, %v115_v47  ;;  %v95_v54 = vstv %s321_s0  ;;  %p208_p11 = por %p207_p10, %p206_p9 }
  0x29   :  { %v88_v50 = vadd.f32 %v87_v34, %v83_v41  ;;  %v121_v57 = vmul.f32 %v171_v48, %v120_v49  ;;  %v124_v60 = vstv %s173_s15 }
  0x2a   :  { %v68_v53 = vadd.f32 %v67_v32, %v65_v45  ;;  %v112_v56 = vadd.f32 %v111_v46, %v107_v51  ;;  %p209_p12 = pnand %p208_p11, %p202_p8 }
  0x2b   :  { %v93_v55 = vadd.f32 %v92_v37, %v88_v50 }
  0x2c   :  { %69 = vst [vmem:[#allocation7] sm:$0x1] %v68_v53  ;;  %v117_v59 = vadd.f32 %v116_v52, %v112_v56 }
  0x2d   :  { %v96_v58 = vadd.f32 %v95_v54, %v93_v55 }
  0x2e   :  { %v122_v61 = vadd.f32 %v121_v57, %v117_v59 }
  0x2f   :  { %98 = vst [vmem:[#allocation7 + $0x1] sm:$0x1] %v96_v58 }
  0x30   :  { %v125_v62 = vadd.f32 %v124_v60, %v122_v61 }
  0x32   :  { %127 = vst [vmem:[#allocation7 + $0x2] sm:$0x1] %v125_v62 }
  0x33   :  { %212 = shalt.err (!%p209_p12)
}
  0x34   :  { %s213_s22 = scalar_lea.hbm %s368_s3, 48 }
  0x35   :  { %p214_p13 = scmp.ne.s32.totalorder %s368_s3, %s213_s22  ;;  %p217_p0 = scmp.lt.u32.totalorder %s213_s22, %s368_s3 }
  0x37   :  { %p219_p1 = pnand %p217_p0, %p214_p13 }
  0x39   :  { %222 = shalt.err (!%p219_p1)
}
  0x3a   :  { %s232_s26 = smov 16   ;;  %s233_s27 = smov 1  }
  0x3b   :  { %139 = dma.vmem_to_hbm [thread:$0]  %s134_s18, 48, %s368_s3, [#allocation3], %s232_s26, %s232_s26, %s233_s27  }
  0x3c   :  { %227 = dma.done.wait [#allocation3], 48  }
  0x3d   :  { %228 = vsyncadd [#allocation3], 4294967248 }
  0x3e   :  { %143 = vsyncpa [#allocation3], 1 }
  0x3f   :  { %144 = vsyncpa [#allocation4], 1 }
  0x40   :  { %145 = vsyncpa [#allocation5], 1 }

</bundles_post_ra>
